<compile_context>
chip_gen: v6e
topology: v6e:2x2x1
jax: 0.10.0
libtpu: 0.0.40
codegen_flags: <defaults>
</compile_context>

<pallas_src>
import functools

import jax
import jax.numpy as jnp
from jax.experimental import pallas as pl
from jax.experimental.pallas import tpu as pltpu


# ----------------------------------------------------------------------------
# Kernel
# ----------------------------------------------------------------------------
def _critic_kernel(
    inv_f, eps,
    obs_ref, act_ref, wt_ref, tv_ref,
    w1h_ref, w1a_ref, qb_ref, w2_ref, w3_ref,
    out_ref,
    h_acc_ref,
):
    k = pl.program_id(1)
    nk = pl.num_programs(1)

    # ---- trunk matmul, accumulated over the repr_dim (K) grid axis ----------
    @pl.when(k == 0)
    def _():
        h_acc_ref[...] = jnp.zeros_like(h_acc_ref)

    h_acc_ref[...] += jnp.dot(
        obs_ref[...], wt_ref[...], preferred_element_type=jnp.float32)

    # ---- epilogue: LayerNorm + Tanh + fused Q heads, only at last K step ----
    @pl.when(k == nk - 1)
    def _():
        bt = tv_ref[0:1, :]
        ln_g = tv_ref[1:2, :]
        ln_b = tv_ref[2:3, :]
        lane_mask = tv_ref[3:4, :]          # 1.0 on real feature lanes, else 0

        h = h_acc_ref[...] + bt             # padded lanes are exactly 0
        mean = jnp.sum(h, axis=-1, keepdims=True) * inv_f
        centered = (h - mean) * lane_mask   # mask padded lanes out of stats
        var = jnp.sum(centered * centered, axis=-1, keepdims=True) * inv_f
        hn = centered * jax.lax.rsqrt(var + eps)
        h = jnp.tanh(hn * ln_g + ln_b)      # padded lanes -> tanh(0) = 0

        # fused Q1||Q2 layer 1, concat-free: h @ W1_h + a @ W1_a + b1
        x = (jnp.dot(h, w1h_ref[...], preferred_element_type=jnp.float32)
             + jnp.dot(act_ref[...], w1a_ref[...],
                       preferred_element_type=jnp.float32)
             + qb_ref[0:1, :])
        x = jnp.maximum(x, 0.0)
        # fused layer 2 (block-diagonal weights keep the heads independent)
        x = jnp.dot(x, w2_ref[...], preferred_element_type=jnp.float32) \
            + qb_ref[1:2, :]
        x = jnp.maximum(x, 0.0)
        # fused layer 3 -> lane-dense [TB, 128] output (q1 lane 0, q2 lane 1)
        b3 = qb_ref[2:3, 0:out_ref.shape[-1]]
        out_ref[...] = jnp.dot(x, w3_ref[...],
                               preferred_element_type=jnp.float32) + b3


# ----------------------------------------------------------------------------
# Wrapper: packing, padding, grid
# ----------------------------------------------------------------------------
def _round_up(x, m):
    return ((x + m - 1) // m) * m


def _pad2(x, rows, cols):
    pr, pc = rows - x.shape[0], cols - x.shape[1]
    if pr == 0 and pc == 0:
        return x
    return jnp.pad(x, ((0, pr), (0, pc)))


def critic_forward(obs, action, params, eps=1e-5):
    """obs: [B, repr_dim], action: [B, action_dim] -> (q1 [B,1], q2 [B,1])."""
    f32 = jnp.float32
    obs = obs.astype(f32)
    action = action.astype(f32)

    B, K = obs.shape
    A = action.shape[1]
    F = params["wt"].shape[1]
    H = params["q1w2"].shape[0]
    H2 = 2 * H

    # ---- padded geometry -----------------------------------------------------
    Fp = _round_up(F, 128)
    Ap = _round_up(A, 128)
    H2p = _round_up(H2, 128)
    OUTP = 128                       # lane-dense output block
    Bp = _round_up(B, 8)
    TB = Bp if Bp <= 128 else 128
    Bp = _round_up(Bp, TB)
    # Trunk contraction (repr_dim): one fully-aligned block if small, else
    # 512-wide blocks accumulated over the "arbitrary" grid axis.
    Kp = _round_up(K, 128)
    if Kp <= 1024:
        TK = Kp
    else:
        TK = 512
        Kp = _round_up(K, TK)

    # ---- pad activations (all padding is zeros -> exact math) ----------------
    obs_p = _pad2(obs, Bp, Kp)
    act_p = _pad2(action, Bp, Ap)

    # ---- pack / pad parameters ----------------------------------------------
    wt_p = _pad2(params["wt"].astype(f32), Kp, Fp)

    # trunk vectors packed into one 8-row, lane-dense array
    trunk_vec = jnp.zeros((8, Fp), f32)
    trunk_vec = trunk_vec.at[0:1, :].set(_pad2(params["bt"].astype(f32), 1, Fp))
    trunk_vec = trunk_vec.at[1:2, :].set(_pad2(params["ln_g"].astype(f32), 1, Fp))
    trunk_vec = trunk_vec.at[2:3, :].set(_pad2(params["ln_b"].astype(f32), 1, Fp))
    trunk_vec = trunk_vec.at[3:4, :].set(_pad2(jnp.ones((1, F), f32), 1, Fp))

    q1w1 = params["q1w1"].astype(f32)
    q2w1 = params["q2w1"].astype(f32)
    w1h = _pad2(jnp.concatenate([q1w1[:F], q2w1[:F]], axis=1), Fp, H2p)
    w1a = _pad2(jnp.concatenate([q1w1[F:], q2w1[F:]], axis=1), Ap, H2p)

    # Q-head biases packed into one 8-row, lane-dense array
    # row 0: b1 (q1||q2), row 1: b2 (q1||q2), row 2: b3 (q1 lane 0, q2 lane 1)
    qb = jnp.zeros((8, H2p), f32)
    qb = qb.at[0:1, :].set(_pad2(jnp.concatenate(
        [params["q1b1"], params["q2b1"]], axis=1).astype(f32), 1, H2p))
    qb = qb.at[1:2, :].set(_pad2(jnp.concatenate(
        [params["q1b2"], params["q2b2"]], axis=1).astype(f32), 1, H2p))
    qb = qb.at[2, 0].set(params["q1b3"][0, 0].astype(f32))
    qb = qb.at[2, 1].set(params["q2b3"][0, 0].astype(f32))

    w2 = jnp.zeros((H2p, H2p), f32)
    w2 = w2.at[:H, :H].set(params["q1w2"].astype(f32))
    w2 = w2.at[H:H2, H:H2].set(params["q2w2"].astype(f32))

    w3 = jnp.zeros((H2p, OUTP), f32)
    w3 = w3.at[:H, 0].set(params["q1w3"][:, 0].astype(f32))
    w3 = w3.at[H:H2, 1].set(params["q2w3"][:, 0].astype(f32))

    # ---- grid / specs ---------------------------------------------------------
    grid = (Bp // TB, Kp // TK)
    kernel = functools.partial(_critic_kernel, 1.0 / F, eps)

    out_p = pl.pallas_call(
        kernel,
        out_shape=jax.ShapeDtypeStruct((Bp, OUTP), f32),
        grid_spec=pltpu.PrefetchScalarGridSpec(
            num_scalar_prefetch=0,
            grid=grid,
            in_specs=[
                pl.BlockSpec((TB, TK), lambda i, k: (i, k)),      # obs
                pl.BlockSpec((TB, Ap), lambda i, k: (i, 0)),      # action (padded)
                pl.BlockSpec((TK, Fp), lambda i, k: (k, 0)),      # trunk W
                pl.BlockSpec((8, Fp), lambda i, k: (0, 0)),       # bt/g/b/mask
                pl.BlockSpec((Fp, H2p), lambda i, k: (0, 0)),     # W1 (h part)
                pl.BlockSpec((Ap, H2p), lambda i, k: (0, 0)),     # W1 (a part)
                pl.BlockSpec((8, H2p), lambda i, k: (0, 0)),      # b1/b2/b3
                pl.BlockSpec((H2p, H2p), lambda i, k: (0, 0)),    # W2 blockdiag
                pl.BlockSpec((H2p, OUTP), lambda i, k: (0, 0)),   # W3 blockdiag
            ],
            out_specs=pl.BlockSpec((TB, OUTP), lambda i, k: (i, 0)),
            scratch_shapes=[pltpu.VMEM((TB, Fp), jnp.float32)],
        ),
        compiler_params=pltpu.CompilerParams(
            dimension_semantics=("parallel", "arbitrary")),
    )(obs_p, act_p, wt_p, trunk_vec, w1h, w1a, qb, w2, w3)

    q1 = out_p[:B, 0:1]
    q2 = out_p[:B, 1:2]
    return q1, q2


# ----------------------------------------------------------------------------
# Synthetic parameters + pure-JAX reference
# ----------------------------------------------------------------------------
def make_params(key, repr_dim, action_dim, feature_dim, hidden_dim):
    """Deterministic synthetic parameters. Weights are [in, out]; biases [1, out]."""
    ks = jax.random.split(key, 16)

    def lin(kw, fan_in, fan_out):
        return jax.random.normal(kw, (fan_in, fan_out), jnp.float32) / jnp.sqrt(fan_in)

    return {
        "wt": lin(ks[0], repr_dim, feature_dim),
        "bt": jnp.zeros((1, feature_dim), jnp.float32),
        "ln_g": jnp.ones((1, feature_dim), jnp.float32),
        "ln_b": jnp.zeros((1, feature_dim), jnp.float32),
        "q1w1": lin(ks[1], feature_dim + action_dim, hidden_dim),
        "q1b1": 0.01 * jax.random.normal(ks[2], (1, hidden_dim), jnp.float32),
        "q1w2": lin(ks[3], hidden_dim, hidden_dim),
        "q1b2": 0.01 * jax.random.normal(ks[4], (1, hidden_dim), jnp.float32),
        "q1w3": lin(ks[5], hidden_dim, 1),
        "q1b3": 0.01 * jax.random.normal(ks[6], (1, 1), jnp.float32),
        "q2w1": lin(ks[7], feature_dim + action_dim, hidden_dim),
        "q2b1": 0.01 * jax.random.normal(ks[8], (1, hidden_dim), jnp.float32),
        "q2w2": lin(ks[9], hidden_dim, hidden_dim),
        "q2b2": 0.01 * jax.random.normal(ks[10], (1, hidden_dim), jnp.float32),
        "q2w3": lin(ks[11], hidden_dim, 1),
        "q2b3": 0.01 * jax.random.normal(ks[12], (1, 1), jnp.float32),
    }


def critic_forward_ref(obs, action, p):
    """Pure-JAX reference (mirrors the PyTorch module semantics)."""
    h = obs @ p["wt"] + p["bt"]
    mean = jnp.mean(h, axis=-1, keepdims=True)
    var = jnp.mean((h - mean) ** 2, axis=-1, keepdims=True)
    h = (h - mean) / jnp.sqrt(var + 1e-5)
    h = jnp.tanh(h * p["ln_g"] + p["ln_b"])
    ha = jnp.concatenate([h, action], axis=-1)

    def q(w1, b1, w2, b2, w3, b3):
        x = jnp.maximum(ha @ w1 + b1, 0.0)
        x = jnp.maximum(x @ w2 + b2, 0.0)
        return x @ w3 + b3

    q1 = q(p["q1w1"], p["q1b1"], p["q1w2"], p["q1b2"], p["q1w3"], p["q1b3"])
    q2 = q(p["q2w1"], p["q2b1"], p["q2w2"], p["q2b2"], p["q2w3"], p["q2b3"])
    return q1, q2


if __name__ == "__main__":
    B = 8
    repr_dim = 32
    action_dim = 4
    feature_dim = 16
    hidden_dim = 32

    key = jax.random.PRNGKey(0)
    k_obs, k_act, k_par = jax.random.split(key, 3)
    obs = jax.random.normal(k_obs, (B, repr_dim), jnp.float32)
    action = jax.random.uniform(k_act, (B, action_dim), jnp.float32, -1.0, 1.0)
    params = make_params(k_par, repr_dim, action_dim, feature_dim, hidden_dim)

    q1, q2 = critic_forward(obs, action, params)
    jax.block_until_ready((q1, q2))

    q1_ref, q2_ref = critic_forward_ref(obs, action, params)
    assert q1.shape == (B, 1) and q2.shape == (B, 1)
    assert jnp.allclose(q1, q1_ref, atol=2e-4, rtol=2e-4)
    assert jnp.allclose(q2, q2_ref, atol=2e-4, rtol=2e-4)

    print("KERNEL_OK")
</pallas_src>

<mosaic_0001>
module attributes {stable_mosaic.version = 11 : i64} {
  func.func @_critic_kernel(%arg0: i32, %arg1: i32, %arg2: memref<8x128xf32, #tpu.memory_space<vmem>>, %arg3: memref<8x128xf32, #tpu.memory_space<vmem>>, %arg4: memref<128x128xf32, #tpu.memory_space<vmem>>, %arg5: memref<8x128xf32, #tpu.memory_space<vmem>>, %arg6: memref<128x128xf32, #tpu.memory_space<vmem>>, %arg7: memref<128x128xf32, #tpu.memory_space<vmem>>, %arg8: memref<8x128xf32, #tpu.memory_space<vmem>>, %arg9: memref<128x128xf32, #tpu.memory_space<vmem>>, %arg10: memref<128x128xf32, #tpu.memory_space<vmem>>, %arg11: memref<8x128xf32, #tpu.memory_space<vmem>>, %arg12: memref<8x128xf32, #tpu.memory_space<vmem>>) attributes {dimension_semantics = [#tpu.dimension_semantics<parallel>, #tpu.dimension_semantics<arbitrary>], iteration_bounds = array<i64: 1, 1>, scalar_prefetch = 0 : i64, scratch_operands = 1 : i64, tpu.core_type = #tpu.core_type<tc>, window_params = [{transform_indices = @transform_0, window_bounds = array<i64: 8, 128>}, {transform_indices = @transform_1, window_bounds = array<i64: 8, 128>}, {transform_indices = @transform_2, window_bounds = array<i64: 128, 128>}, {pipeline_mode = #tpu.pipeline_mode<synchronous>, transform_indices = @transform_3, window_bounds = array<i64: 8, 128>}, {pipeline_mode = #tpu.pipeline_mode<synchronous>, transform_indices = @transform_4, window_bounds = array<i64: 128, 128>}, {pipeline_mode = #tpu.pipeline_mode<synchronous>, transform_indices = @transform_5, window_bounds = array<i64: 128, 128>}, {pipeline_mode = #tpu.pipeline_mode<synchronous>, transform_indices = @transform_6, window_bounds = array<i64: 8, 128>}, {pipeline_mode = #tpu.pipeline_mode<synchronous>, transform_indices = @transform_7, window_bounds = array<i64: 128, 128>}, {pipeline_mode = #tpu.pipeline_mode<synchronous>, transform_indices = @transform_8, window_bounds = array<i64: 128, 128>}, {transform_indices = @transform_9, window_bounds = array<i64: 8, 128>}]} {
    %c0_i32 = arith.constant 0 : i32
    %0 = arith.cmpi eq, %arg1, %c0_i32 : i32
    %1 = arith.extui %0 : i1 to i32
    %c0_i32_0 = arith.constant 0 : i32
    %2 = arith.cmpi ne, %1, %c0_i32_0 : i32
    scf.if %2 {
      %cst_10 = arith.constant 0.000000e+00 : f32
      %12 = vector.broadcast %cst_10 : f32 to vector<8x128xf32>
      %c0_11 = arith.constant 0 : index
      %c0_12 = arith.constant 0 : index
      %13 = vector.load %arg12[%c0_11, %c0_12] : memref<8x128xf32, #tpu.memory_space<vmem>>, vector<8x128xf32>
      tpu.vector_store %arg12[%c0_11, %c0_12], %12 {strides = array<i32>} : memref<8x128xf32, #tpu.memory_space<vmem>>, vector<8x128xf32>,
    } else {
    }
    %c0 = arith.constant 0 : index
    %c0_1 = arith.constant 0 : index
    %3 = vector.load %arg12[%c0, %c0_1] : memref<8x128xf32, #tpu.memory_space<vmem>>, vector<8x128xf32>
    %c0_2 = arith.constant 0 : index
    %c0_3 = arith.constant 0 : index
    %4 = vector.load %arg2[%c0_2, %c0_3] : memref<8x128xf32, #tpu.memory_space<vmem>>, vector<8x128xf32>
    %c0_4 = arith.constant 0 : index
    %c0_5 = arith.constant 0 : index
    %5 = vector.load %arg4[%c0_4, %c0_5] : memref<128x128xf32, #tpu.memory_space<vmem>>, vector<128x128xf32>
    %cst = arith.constant dense<0.000000e+00> : vector<8x128xf32>
    %6 = tpu.matmul %4, %5, %cst {dimension_numbers = #tpu.dot_dimension_numbers<[1], [0], [0], [1], [0, 0, 1, 1], [], []>} : vector<8x128xf32>, vector<128x128xf32>, vector<8x128xf32> -> vector<8x128xf32>
    %7 = arith.addf %3, %6 : vector<8x128xf32>
    %c0_6 = arith.constant 0 : index
    %c0_7 = arith.constant 0 : index
    %8 = vector.load %arg12[%c0_6, %c0_7] : memref<8x128xf32, #tpu.memory_space<vmem>>, vector<8x128xf32>
    tpu.vector_store %arg12[%c0_6, %c0_7], %7 {strides = array<i32>} : memref<8x128xf32, #tpu.memory_space<vmem>>, vector<8x128xf32>,
    %c0_i32_8 = arith.constant 0 : i32
    %9 = arith.cmpi eq, %arg1, %c0_i32_8 : i32
    %10 = arith.extui %9 : i1 to i32
    %c0_i32_9 = arith.constant 0 : i32
    %11 = arith.cmpi ne, %10, %c0_i32_9 : i32
    scf.if %11 {
      %c0_10 = arith.constant 0 : index
      %c0_11 = arith.constant 0 : index
      %12 = vector.load %arg5[%c0_10, %c0_11] : memref<8x128xf32, #tpu.memory_space<vmem>>, vector<1x128xf32>
      %c1 = arith.constant 1 : index
      %c0_12 = arith.constant 0 : index
      %13 = vector.load %arg5[%c1, %c0_12] : memref<8x128xf32, #tpu.memory_space<vmem>>, vector<1x128xf32>
      %c2 = arith.constant 2 : index
      %c0_13 = arith.constant 0 : index
      %14 = vector.load %arg5[%c2, %c0_13] : memref<8x128xf32, #tpu.memory_space<vmem>>, vector<1x128xf32>
      %c3 = arith.constant 3 : index
      %c0_14 = arith.constant 0 : index
      %15 = vector.load %arg5[%c3, %c0_14] : memref<8x128xf32, #tpu.memory_space<vmem>>, vector<1x128xf32>
      %c0_15 = arith.constant 0 : index
      %c0_16 = arith.constant 0 : index
      %16 = vector.load %arg12[%c0_15, %c0_16] : memref<8x128xf32, #tpu.memory_space<vmem>>, vector<8x128xf32>
      %17 = vector.broadcast %12 : vector<1x128xf32> to vector<8x128xf32>
      %18 = arith.addf %16, %17 : vector<8x128xf32>
      %cst_17 = arith.constant dense<0.000000e+00> : vector<8xf32>
      %19 = vector.multi_reduction <add>, %18, %cst_17 [1] : vector<8x128xf32> to vector<8xf32>
      %20 = vector.shape_cast %19 : vector<8xf32> to vector<8x1xf32>
      %cst_18 = arith.constant 6.250000e-02 : f32
      %21 = vector.broadcast %cst_18 : f32 to vector<8x1xf32>
      %22 = arith.mulf %20, %21 : vector<8x1xf32>
      %23 = vector.broadcast %22 : vector<8x1xf32> to vector<8x128xf32>
      %24 = arith.subf %18, %23 : vector<8x128xf32>
      %25 = vector.broadcast %15 : vector<1x128xf32> to vector<8x128xf32>
      %26 = arith.mulf %24, %25 : vector<8x128xf32>
      %27 = arith.mulf %26, %26 : vector<8x128xf32>
      %cst_19 = arith.constant dense<0.000000e+00> : vector<8xf32>
      %28 = vector.multi_reduction <add>, %27, %cst_19 [1] : vector<8x128xf32> to vector<8xf32>
      %29 = vector.shape_cast %28 : vector<8xf32> to vector<8x1xf32>
      %cst_20 = arith.constant 6.250000e-02 : f32
      %30 = vector.broadcast %cst_20 : f32 to vector<8x1xf32>
      %31 = arith.mulf %29, %30 : vector<8x1xf32>
      %cst_21 = arith.constant 9.99999974E-6 : f32
      %32 = vector.broadcast %cst_21 : f32 to vector<8x1xf32>
      %33 = arith.addf %31, %32 : vector<8x1xf32>
      %34 = math.rsqrt %33 : vector<8x1xf32>
      %35 = vector.broadcast %34 : vector<8x1xf32> to vector<8x128xf32>
      %36 = arith.mulf %26, %35 : vector<8x128xf32>
      %37 = vector.broadcast %13 : vector<1x128xf32> to vector<8x128xf32>
      %38 = arith.mulf %36, %37 : vector<8x128xf32>
      %39 = vector.broadcast %14 : vector<1x128xf32> to vector<8x128xf32>
      %40 = arith.addf %38, %39 : vector<8x128xf32>
      %41 = math.tanh %40 : vector<8x128xf32>
      %c0_22 = arith.constant 0 : index
      %c0_23 = arith.constant 0 : index
      %42 = vector.load %arg6[%c0_22, %c0_23] : memref<128x128xf32, #tpu.memory_space<vmem>>, vector<128x128xf32>
      %cst_24 = arith.constant dense<0.000000e+00> : vector<8x128xf32>
      %43 = tpu.matmul %41, %42, %cst_24 {dimension_numbers = #tpu.dot_dimension_numbers<[1], [0], [0], [1], [0, 0, 1, 1], [], []>} : vector<8x128xf32>, vector<128x128xf32>, vector<8x128xf32> -> vector<8x128xf32>
      %c0_25 = arith.constant 0 : index
      %c0_26 = arith.constant 0 : index
      %44 = vector.load %arg3[%c0_25, %c0_26] : memref<8x128xf32, #tpu.memory_space<vmem>>, vector<8x128xf32>
      %c0_27 = arith.constant 0 : index
      %c0_28 = arith.constant 0 : index
      %45 = vector.load %arg7[%c0_27, %c0_28] : memref<128x128xf32, #tpu.memory_space<vmem>>, vector<128x128xf32>
      %cst_29 = arith.constant dense<0.000000e+00> : vector<8x128xf32>
      %46 = tpu.matmul %44, %45, %cst_29 {dimension_numbers = #tpu.dot_dimension_numbers<[1], [0], [0], [1], [0, 0, 1, 1], [], []>} : vector<8x128xf32>, vector<128x128xf32>, vector<8x128xf32> -> vector<8x128xf32>
      %47 = arith.addf %43, %46 : vector<8x128xf32>
      %c0_30 = arith.constant 0 : index
      %c0_31 = arith.constant 0 : index
      %48 = vector.load %arg8[%c0_30, %c0_31] : memref<8x128xf32, #tpu.memory_space<vmem>>, vector<1x128xf32>
      %49 = vector.broadcast %48 : vector<1x128xf32> to vector<8x128xf32>
      %50 = arith.addf %47, %49 : vector<8x128xf32>
      %cst_32 = arith.constant 0.000000e+00 : f32
      %51 = vector.broadcast %cst_32 : f32 to vector<8x128xf32>
      %52 = arith.maximumf %50, %51 : vector<8x128xf32>
      %c0_33 = arith.constant 0 : index
      %c0_34 = arith.constant 0 : index
      %53 = vector.load %arg9[%c0_33, %c0_34] : memref<128x128xf32, #tpu.memory_space<vmem>>, vector<128x128xf32>
      %cst_35 = arith.constant dense<0.000000e+00> : vector<8x128xf32>
      %54 = tpu.matmul %52, %53, %cst_35 {dimension_numbers = #tpu.dot_dimension_numbers<[1], [0], [0], [1], [0, 0, 1, 1], [], []>} : vector<8x128xf32>, vector<128x128xf32>, vector<8x128xf32> -> vector<8x128xf32>
      %c1_36 = arith.constant 1 : index
      %c0_37 = arith.constant 0 : index
      %55 = vector.load %arg8[%c1_36, %c0_37] : memref<8x128xf32, #tpu.memory_space<vmem>>, vector<1x128xf32>
      %56 = vector.broadcast %55 : vector<1x128xf32> to vector<8x128xf32>
      %57 = arith.addf %54, %56 : vector<8x128xf32>
      %cst_38 = arith.constant 0.000000e+00 : f32
      %58 = vector.broadcast %cst_38 : f32 to vector<8x128xf32>
      %59 = arith.maximumf %57, %58 : vector<8x128xf32>
      %c2_39 = arith.constant 2 : index
      %c0_40 = arith.constant 0 : index
      %60 = vector.load %arg8[%c2_39, %c0_40] : memref<8x128xf32, #tpu.memory_space<vmem>>, vector<1x128xf32>
      %c0_41 = arith.constant 0 : index
      %c0_42 = arith.constant 0 : index
      %61 = vector.load %arg10[%c0_41, %c0_42] : memref<128x128xf32, #tpu.memory_space<vmem>>, vector<128x128xf32>
      %cst_43 = arith.constant dense<0.000000e+00> : vector<8x128xf32>
      %62 = tpu.matmul %59, %61, %cst_43 {dimension_numbers = #tpu.dot_dimension_numbers<[1], [0], [0], [1], [0, 0, 1, 1], [], []>} : vector<8x128xf32>, vector<128x128xf32>, vector<8x128xf32> -> vector<8x128xf32>
      %63 = vector.broadcast %60 : vector<1x128xf32> to vector<8x128xf32>
      %64 = arith.addf %62, %63 : vector<8x128xf32>
      %c0_44 = arith.constant 0 : index
      %c0_45 = arith.constant 0 : index
      %65 = vector.load %arg11[%c0_44, %c0_45] : memref<8x128xf32, #tpu.memory_space<vmem>>, vector<8x128xf32>
      tpu.vector_store %arg11[%c0_44, %c0_45], %64 {strides = array<i32>} : memref<8x128xf32, #tpu.memory_space<vmem>>, vector<8x128xf32>,
    } else {
    }
    return
  }
  func.func @transform_0(%arg0: i32, %arg1: i32) -> (i32, i32) {
    %c0_i32 = arith.constant 0 : i32
    return %arg0, %arg1 : i32, i32
  }
  func.func @transform_1(%arg0: i32, %arg1: i32) -> (i32, i32) {
    %c0_i32 = arith.constant 0 : i32
    %c0_i32_0 = arith.constant 0 : i32
    return %arg0, %c0_i32 : i32, i32
  }
  func.func @transform_2(%arg0: i32, %arg1: i32) -> (i32, i32) {
    %c0_i32 = arith.constant 0 : i32
    %c0_i32_0 = arith.constant 0 : i32
    return %arg1, %c0_i32 : i32, i32
  }
  func.func @transform_3(%arg0: i32, %arg1: i32) -> (i32, i32) {
    %c0_i32 = arith.constant 0 : i32
    %c0_i32_0 = arith.constant 0 : i32
    %c0_i32_1 = arith.constant 0 : i32
    return %c0_i32, %c0_i32_0 : i32, i32
  }
  func.func @transform_4(%arg0: i32, %arg1: i32) -> (i32, i32) {
    %c0_i32 = arith.constant 0 : i32
    %c0_i32_0 = arith.constant 0 : i32
    %c0_i32_1 = arith.constant 0 : i32
    return %c0_i32, %c0_i32_0 : i32, i32
  }
  func.func @transform_5(%arg0: i32, %arg1: i32) -> (i32, i32) {
    %c0_i32 = arith.constant 0 : i32
    %c0_i32_0 = arith.constant 0 : i32
    %c0_i32_1 = arith.constant 0 : i32
    return %c0_i32, %c0_i32_0 : i32, i32
  }
  func.func @transform_6(%arg0: i32, %arg1: i32) -> (i32, i32) {
    %c0_i32 = arith.constant 0 : i32
    %c0_i32_0 = arith.constant 0 : i32
    %c0_i32_1 = arith.constant 0 : i32
    return %c0_i32, %c0_i32_0 : i32, i32
  }
  func.func @transform_7(%arg0: i32, %arg1: i32) -> (i32, i32) {
    %c0_i32 = arith.constant 0 : i32
    %c0_i32_0 = arith.constant 0 : i32
    %c0_i32_1 = arith.constant 0 : i32
    return %c0_i32, %c0_i32_0 : i32, i32
  }
  func.func @transform_8(%arg0: i32, %arg1: i32) -> (i32, i32) {
    %c0_i32 = arith.constant 0 : i32
    %c0_i32_0 = arith.constant 0 : i32
    %c0_i32_1 = arith.constant 0 : i32
    return %c0_i32, %c0_i32_0 : i32, i32
  }
  func.func @transform_9(%arg0: i32, %arg1: i32) -> (i32, i32) {
    %c0_i32 = arith.constant 0 : i32
    %c0_i32_0 = arith.constant 0 : i32
    return %arg0, %c0_i32 : i32, i32
  }
}

</mosaic_0001>

<bundles_post_ra>
// kernel: tpu_custom_call.1
= control target key start
LH: loop header
LB: loop body
LE: loop exit
PB: predicated region body
PF: predicated region fallthrough
CT: control target
= control target key end

     0   :  { %14 = vsyncpa [#allocation4], 0  ;;  %s1339_s0 = inlined_call_operand.hbm [shape: f32[8,128], index: 0, kind: input, shape index: {}]   ;;  %s1340_s1 = inlined_call_operand.hbm [shape: f32[8,128], index: 1, kind: input, shape index: {}]   ;;  %s1341_s2 = inlined_call_operand.hbm [shape: f32[128,128], index: 2, kind: input, shape index: {}]   ;;  %s1342_s3 = inlined_call_operand.hbm [shape: f32[8,128], index: 3, kind: input, shape index: {}]   ;;  %s1343_s4 = inlined_call_operand.hbm [shape: f32[128,128], index: 4, kind: input, shape index: {}]   ;;  %s1344_s5 = inlined_call_operand.hbm [shape: f32[128,128], index: 5, kind: input, shape index: {}]   ;;  %s1345_s6 = inlined_call_operand.vmem [shape: f32[8,128], index: 6, kind: input, shape index: {}]   ;;  %s1346_s7 = inlined_call_operand.hbm [shape: f32[128,128], index: 7, kind: input, shape index: {}]   ;;  %s1347_s8 = inlined_call_operand.hbm [shape: f32[128,128], index: 8, kind: input, shape index: {}]   ;;  %s1348_s9 = inlined_call_operand.hbm [shape: f32[8,128], index: 9, kind: output, shape index: {}]  }
   0x1   :  { %15 = vsyncpa [#allocation7], 0 }
   0x2   :  { %16 = vsyncpa [#allocation10], 0 }
   0x3   :  { %17 = vsyncpa [#allocation13], 0 }
   0x4   :  { %18 = vsyncpa [#allocation16], 0 }
   0x5   :  { %19 = vsyncpa [#allocation5], 0  ;;  %s1130_s30 = smov [#allocation6]   ;;  %s1131_s11 = smov [#allocation9]  }
   0x6   :  { %s36_s10 = sshll.u32 %s1130_s30, 4  ;;  %s58_s12 = sshll.u32 %s1131_s11, 4  ;;  %s37_s10 = int_to_ptr.vmem [resolvable:$true] %s36_s10  ;;  %s59_s12 = int_to_ptr.vmem [resolvable:$true] %s58_s12 }
   0x7   :  { %s946_s13 = scalar_lea.vmem %s37_s10, 128  ;;  %p951_p1 = scmp.lt.s32.totalorder %s37_s10, %s37_s10 }
   0x8   :  { %p947_p0 = scmp.ne.s32.totalorder %s37_s10, %s946_s13  ;;  %p952_p2 = scmp.lt.s32.totalorder %s946_s13, %s946_s13 }
   0xa   :  { %p953_p3 = por %p952_p2, %p951_p1 }
   0xc   :  { %p954_p4 = pnand %p953_p3, %p947_p0 }
   0xe   :  { %957 = shalt.err (!%p954_p4)
}
   0xf   :  { %39 = dma.hbm_to_vmem [thread:$0]  %s1340_s1, 128, %s37_s10, [#allocation7]  }
  0x10   :  { %s966_s16 = scalar_lea.vmem %s59_s12, 128  ;;  %p971_p6 = scmp.lt.s32.totalorder %s59_s12, %s59_s12 }
  0x11   :  { %p967_p5 = scmp.ne.s32.totalorder %s59_s12, %s966_s16  ;;  %p972_p7 = scmp.lt.s32.totalorder %s966_s16, %s966_s16 }
  0x13   :  { %p973_p8 = por %p972_p7, %p971_p6 }
  0x15   :  { %p974_p9 = pnand %p973_p8, %p967_p5 }
  0x17   :  { %977 = shalt.err (!%p974_p9)
}
  0x18   :  { %61 = dma.hbm_to_vmem [thread:$0]  %s1342_s3, 128, %s59_s12, [#allocation10]  }
  0x19   :  { %s1132_s19 = smov [#allocation12]   ;;  %s1133_s21 = smov [#allocation3]  }
  0x1a   :  { %s79_s20 = sshll.u32 %s1132_s19, 4  ;;  %s26_s22 = sshll.u32 %s1133_s21, 4  ;;  %s80_s20 = int_to_ptr.vmem [resolvable:$true] %s79_s20  ;;  %s27_s22 = int_to_ptr.vmem [resolvable:$true] %s26_s22 }
  0x1b   :  { %s986_s23 = scalar_lea.vmem %s80_s20, 2048  ;;  %p991_p11 = scmp.lt.s32.totalorder %s80_s20, %s80_s20 }
  0x1c   :  { %p987_p10 = scmp.ne.s32.totalorder %s80_s20, %s986_s23  ;;  %p992_p12 = scmp.lt.s32.totalorder %s986_s23, %s986_s23 }
  0x1e   :  { %p993_p13 = por %p992_p12, %p991_p11 }
  0x20   :  { %p994_p0 = pnand %p993_p13, %p987_p10 }
  0x22   :  { %997 = shalt.err (!%p994_p0)
}
  0x23   :  { %s1134_s1 = smov 128   ;;  %s1135_s24 = smov 8  }
  0x24   :  { %85 = dma.hbm_to_vmem [thread:$0]  %s1344_s5, 2048, %s80_s20, [#allocation13], %s1134_s1, %s1134_s1, %s1135_s24  }
  0x25   :  { %s1006_s26 = scalar_lea.vmem %s27_s22, 128  ;;  %p1011_p2 = scmp.lt.s32.totalorder %s27_s22, %s27_s22 }
  0x26   :  { %p1007_p1 = scmp.ne.s32.totalorder %s27_s22, %s1006_s26  ;;  %p1012_p3 = scmp.lt.s32.totalorder %s1006_s26, %s1006_s26 }
  0x28   :  { %p1013_p4 = por %p1012_p3, %p1011_p2 }
  0x2a   :  { %p1014_p5 = pnand %p1013_p4, %p1007_p1 }
  0x2c   :  { %1017 = shalt.err (!%p1014_p5)
}
  0x2d   :  { %29 = dma.hbm_to_vmem [thread:$0]  %s1339_s0, 128, %s27_s22, [#allocation4]  }
  0x2e   :  { %s1136_s29 = smov [#allocation8]   ;;  %s1137_s10 = smov [#allocation11]  }
  0x2f   :  { %s45_s30 = sshll.u32 %s1136_s29, 4  ;;  %s67_s11 = sshll.u32 %s1137_s10, 4  ;;  %s46_s30 = int_to_ptr.vmem [resolvable:$true] %s45_s30  ;;  %s68_s11 = int_to_ptr.vmem [resolvable:$true] %s67_s11 }
  0x30   :  { %s1026_s12 = scalar_lea.vmem %s46_s30, 2048  ;;  %p1031_p7 = scmp.lt.s32.totalorder %s46_s30, %s46_s30 }
  0x31   :  { %p1027_p6 = scmp.ne.s32.totalorder %s46_s30, %s1026_s12  ;;  %p1032_p8 = scmp.lt.s32.totalorder %s1026_s12, %s1026_s12 }
  0x33   :  { %p1033_p9 = por %p1032_p8, %p1031_p7 }
  0x35   :  { %p1034_p10 = pnand %p1033_p9, %p1027_p6 }
  0x37   :  { %1037 = shalt.err (!%p1034_p10)
}
  0x38   :  { %51 = dma.hbm_to_vmem [thread:$0]  %s1341_s2, 2048, %s46_s30, [#allocation7], %s1134_s1, %s1134_s1, %s1135_s24  }
  0x39   :  { %s1046_s0 = scalar_lea.vmem %s68_s11, 2048  ;;  %p1051_p12 = scmp.lt.s32.totalorder %s68_s11, %s68_s11 }
  0x3a   :  { %p1047_p11 = scmp.ne.s32.totalorder %s68_s11, %s1046_s0  ;;  %p1052_p13 = scmp.lt.s32.totalorder %s1046_s0, %s1046_s0 }
  0x3c   :  { %p1053_p0 = por %p1052_p13, %p1051_p12 }
  0x3e   :  { %p1054_p1 = pnand %p1053_p0, %p1047_p11 }
  0x40   :  { %1057 = shalt.err (!%p1054_p1)
}
  0x41   :  { %73 = dma.hbm_to_vmem [thread:$0]  %s1343_s4, 2048, %s68_s11, [#allocation10], %s1134_s1, %s1134_s1, %s1135_s24  }
  0x42   :  { %s1138_s16 = smov [#allocation14]   ;;  %s1139_s18 = smov [#allocation15]  }
  0x43   :  { %s93_s17 = sshll.u32 %s1138_s16, 4  ;;  %s105_s19 = sshll.u32 %s1139_s18, 4  ;;  %s94_s17 = int_to_ptr.vmem [resolvable:$true] %s93_s17  ;;  %s106_s19 = int_to_ptr.vmem [resolvable:$true] %s105_s19 }
  0x44   :  { %s1066_s2 = scalar_lea.vmem %s94_s17, 2048  ;;  %p1071_p3 = scmp.lt.s32.totalorder %s94_s17, %s94_s17 }
  0x45   :  { %p1067_p2 = scmp.ne.s32.totalorder %s94_s17, %s1066_s2  ;;  %p1072_p4 = scmp.lt.s32.totalorder %s1066_s2, %s1066_s2 }
  0x47   :  { %p1073_p5 = por %p1072_p4, %p1071_p3 }
  0x49   :  { %p1074_p6 = pnand %p1073_p5, %p1067_p2 }
  0x4b   :  { %1077 = shalt.err (!%p1074_p6)
}
  0x4c   :  { %99 = dma.hbm_to_vmem [thread:$0]  %s1346_s7, 2048, %s94_s17, [#allocation13], %s1134_s1, %s1134_s1, %s1135_s24  }
  0x4d   :  { %s1086_s4 = scalar_lea.vmem %s106_s19, 2048  ;;  %p1091_p8 = scmp.lt.s32.totalorder %s106_s19, %s106_s19 }
  0x4e   :  { %p1087_p7 = scmp.ne.s32.totalorder %s106_s19, %s1086_s4  ;;  %p1092_p9 = scmp.lt.s32.totalorder %s1086_s4, %s1086_s4 }
  0x50   :  { %p1093_p10 = por %p1092_p9, %p1091_p8 }
  0x52   :  { %p1094_p11 = pnand %p1093_p10, %p1087_p7 }
  0x54   :  { %1097 = shalt.err (!%p1094_p11)
}
  0x55   :  { %111 = dma.hbm_to_vmem [thread:$0]  %s1347_s8, 2048, %s106_s19, [#allocation16], %s1134_s1, %s1134_s1, %s1135_s24  }
  0x56   :  { %1118 = dma.done.wait [#allocation4], 128  }
  0x57   :  { %1119 = vsyncadd [#allocation4], 4294967168 }
  0x58   :  { %1120 = dma.done.wait [#allocation7], 2176  }
  0x59   :  { %1121 = vsyncadd [#allocation7], 4294965120 }
  0x5a   :  { %1122 = dma.done.wait [#allocation10], 2176  }
  0x5b   :  { %1123 = vsyncadd [#allocation10], 4294965120 }
  0x5c   :  { %1124 = dma.done.wait [#allocation13], 4096  }
  0x5d   :  { %1125 = vsyncadd [#allocation13], 4294963200 }
  0x5e   :  { %1126 = dma.done.wait [#allocation16], 2048  }
  0x5f   :  { %1127 = vsyncadd [#allocation16], 4294965248  ;;  %v1140_v0 = vmov 0.0   ;;  %vm1141_vm0 = vmmov 0   ;;  %v158_v1 = vld [vmem:[#allocation8 + $0x78] sm:$0xff]  ;;  %v157_v2 = vld [vmem:[#allocation8 + $0x70] sm:$0xff] }
  0x60   :  { %746 = vmatprep.subr.mxu0 %v1140_v0  ;;  %778 = vmatprep.mubr.msk.f32.mxu0 %vm1141_vm0, %v1140_v0  ;;  %v156_v3 = vld [vmem:[#allocation8 + $0x68] sm:$0xff]  ;;  %v155_v4 = vld [vmem:[#allocation8 + $0x60] sm:$0xff]  ;;  %v154_v5 = vld [vmem:[#allocation8 + $0x58] sm:$0xff]  ;;  %s1142_s26 = smov [#allocation17]  }
  0x61   :  { %781 = vmatprep.subr.mxu1 %v1140_v0  ;;  %813 = vmatprep.mubr.msk.f32.mxu1 %vm1141_vm0, %v1140_v0  ;;  %v153_v6 = vld [vmem:[#allocation8 + $0x50] sm:$0xff]  ;;  %v152_v7 = vld [vmem:[#allocation8 + $0x48] sm:$0xff]  ;;  %v151_v8 = vld [vmem:[#allocation8 + $0x40] sm:$0xff]  ;;  %s641_s27 = sshll.u32 %s1142_s26, 4  ;;  %s642_s27 = int_to_ptr.vmem [resolvable:$true] %s641_s27 }
  0x62   :  { %747 = vmatpush3.msra.mxu0 %v158_v1  ;;  %v150_v9 = vld [vmem:[#allocation8 + $0x38] sm:$0xff]  ;;  %v149_v10 = vld [vmem:[#allocation8 + $0x30] sm:$0xff]  ;;  %v148_v11 = vld [vmem:[#allocation8 + $0x28] sm:$0xff]  ;;  %s1098_s28 = scalar_lea.vmem %s642_s27, 128  ;;  %p1103_p13 = scmp.lt.s32.totalorder %s642_s27, %s642_s27 }
  0x63   :  { %748 = vmatprep.subr.mxu0 %v1140_v0  ;;  %v147_v12 = vld [vmem:[#allocation8 + $0x20] sm:$0xff]  ;;  %v146_v13 = vld [vmem:[#allocation8 + $0x18] sm:$0xff]  ;;  %v145_v14 = vld [vmem:[#allocation8 + $0x10] sm:$0xff]  ;;  %p1099_p12 = scmp.ne.s32.totalorder %s642_s27, %s1098_s28  ;;  %p1104_p0 = scmp.lt.s32.totalorder %s1098_s28, %s1098_s28 }
  0x64   :  { %749 = vmatpush3.msra.mxu0 %v157_v2  ;;  %v144_v15 = vld [vmem:[#allocation8 + $0x8] sm:$0xff]  ;;  %v143_v16 = vld [vmem:[#allocation8] sm:$0xff]  ;;  %v142_v17 = vld [vmem:[#allocation3] sm:$0xff] }
  0x65   :  { %750 = vmatprep.subr.mxu0 %v1140_v0  ;;  %v654_v18 = vld [vmem:[#allocation9] ss:$0 sm:$0xff]  ;;  %v655_v24 = vld [vmem:[#allocation9 + $0x3] ss:$0 sm:$0xff]  ;;  %v302_v29 = vld [vmem:[#allocation12 + $0x70] sm:$0xff]  ;;  %p1105_p1 = por %p1104_p0, %p1103_p13 }
  0x66   :  { %751 = vmatpush3.msra.mxu0 %v156_v3  ;;  %v303_v28 = vld [vmem:[#allocation12 + $0x78] sm:$0xff]  ;;  %v301_v31 = vld [vmem:[#allocation12 + $0x68] sm:$0xff]  ;;  %v285_v32 = vld [vmem:[#allocation11 + $0x70] sm:$0xff] }
  0x67   :  { %752 = vmatprep.subr.mxu0 %v1140_v0  ;;  %782 = vmatpush3.msra.mxu1 %v303_v28  ;;  %v286_v30 = vld [vmem:[#allocation11 + $0x78] sm:$0xff]  ;;  %v300_v33 = vld [vmem:[#allocation12 + $0x60] sm:$0xff]  ;;  %v284_v34 = vld [vmem:[#allocation11 + $0x68] sm:$0xff]  ;;  %p1106_p2 = pnand %p1105_p1, %p1099_p12 }
  0x68   :  { %753 = vmatpush3.msra.mxu0 %v155_v4  ;;  %783 = vmatprep.subr.mxu1 %v1140_v0  ;;  %v299_v35 = vld [vmem:[#allocation12 + $0x58] sm:$0xff]  ;;  %v283_v36 = vld [vmem:[#allocation11 + $0x60] sm:$0xff]  ;;  %v298_v37 = vld [vmem:[#allocation12 + $0x50] sm:$0xff] }
  0x69   :  { %754 = vmatprep.subr.mxu0 %v1140_v0  ;;  %784 = vmatpush3.msra.mxu1 %v302_v29  ;;  %v282_v38 = vld [vmem:[#allocation11 + $0x58] sm:$0xff]  ;;  %v297_v39 = vld [vmem:[#allocation12 + $0x48] sm:$0xff]  ;;  %v281_v40 = vld [vmem:[#allocation11 + $0x50] sm:$0xff] }
  0x6a   :  { %755 = vmatpush3.msra.mxu0 %v154_v5  ;;  %785 = vmatprep.subr.mxu1 %v1140_v0  ;;  %v296_v41 = vld [vmem:[#allocation12 + $0x40] sm:$0xff]  ;;  %v280_v42 = vld [vmem:[#allocation11 + $0x48] sm:$0xff]  ;;  %v295_v43 = vld [vmem:[#allocation12 + $0x38] sm:$0xff] }
  0x6b   :  { %756 = vmatprep.subr.mxu0 %v1140_v0  ;;  %786 = vmatpush3.msra.mxu1 %v301_v31  ;;  %v279_v44 = vld [vmem:[#allocation11 + $0x40] sm:$0xff]  ;;  %v294_v45 = vld [vmem:[#allocation12 + $0x30] sm:$0xff]  ;;  %v278_v46 = vld [vmem:[#allocation11 + $0x38] sm:$0xff] }
  0x6c   :  { %757 = vmatpush3.msra.mxu0 %v153_v6  ;;  %787 = vmatprep.subr.mxu1 %v1140_v0  ;;  %v293_v47 = vld [vmem:[#allocation12 + $0x28] sm:$0xff]  ;;  %v277_v48 = vld [vmem:[#allocation11 + $0x30] sm:$0xff]  ;;  %v292_v49 = vld [vmem:[#allocation12 + $0x20] sm:$0xff] }
  0x6d   :  { %758 = vmatprep.subr.mxu0 %v1140_v0  ;;  %788 = vmatpush3.msra.mxu1 %v300_v33  ;;  %v276_v50 = vld [vmem:[#allocation11 + $0x28] sm:$0xff]  ;;  %v291_v51 = vld [vmem:[#allocation12 + $0x18] sm:$0xff]  ;;  %v275_v52 = vld [vmem:[#allocation11 + $0x20] sm:$0xff] }
  0x6e   :  { %759 = vmatpush3.msra.mxu0 %v152_v7  ;;  %789 = vmatprep.subr.mxu1 %v1140_v0  ;;  %v290_v53 = vld [vmem:[#allocation12 + $0x10] sm:$0xff]  ;;  %v274_v54 = vld [vmem:[#allocation11 + $0x18] sm:$0xff]  ;;  %v289_v55 = vld [vmem:[#allocation12 + $0x8] sm:$0xff] }
  0x6f   :  { %760 = vmatprep.subr.mxu0 %v1140_v0  ;;  %790 = vmatpush3.msra.mxu1 %v299_v35  ;;  %v273_v56 = vld [vmem:[#allocation11 + $0x10] sm:$0xff]  ;;  %v288_v57 = vld [vmem:[#allocation12] sm:$0xff]  ;;  %v272_v58 = vld [vmem:[#allocation11 + $0x8] sm:$0xff] }
  0x70   :  { %761 = vmatpush3.msra.mxu0 %v151_v8  ;;  %791 = vmatprep.subr.mxu1 %v1140_v0  ;;  %v287_v59 = vld [vmem:[#allocation6] sm:$0xff]  ;;  %v271_v60 = vld [vmem:[#allocation11] sm:$0xff]  ;;  %v466_v61 = vld [vmem:[#allocation14 + $0x78] sm:$0xff] }
  0x71   :  { %762 = vmatprep.subr.mxu0 %v1140_v0  ;;  %792 = vmatpush3.msra.mxu1 %v298_v37  ;;  %v465_v62 = vld [vmem:[#allocation14 + $0x70] sm:$0xff]  ;;  %v464_v63 = vld [vmem:[#allocation14 + $0x68] sm:$0xff]  ;;  %v463_v1 = vld [vmem:[#allocation14 + $0x60] sm:$0xff] }
  0x72   :  { %763 = vmatpush3.msra.mxu0 %v150_v9  ;;  %793 = vmatprep.subr.mxu1 %v1140_v0  ;;  %v462_v2 = vld [vmem:[#allocation14 + $0x58] sm:$0xff]  ;;  %v461_v3 = vld [vmem:[#allocation14 + $0x50] sm:$0xff]  ;;  %v460_v4 = vld [vmem:[#allocation14 + $0x48] sm:$0xff] }
  0x73   :  { %764 = vmatprep.subr.mxu0 %v1140_v0  ;;  %794 = vmatpush3.msra.mxu1 %v297_v39  ;;  %v459_v5 = vld [vmem:[#allocation14 + $0x40] sm:$0xff]  ;;  %v458_v6 = vld [vmem:[#allocation14 + $0x38] sm:$0xff]  ;;  %v457_v7 = vld [vmem:[#allocation14 + $0x30] sm:$0xff] }
  0x74   :  { %765 = vmatpush3.msra.mxu0 %v149_v10  ;;  %795 = vmatprep.subr.mxu1 %v1140_v0  ;;  %v456_v8 = vld [vmem:[#allocation14 + $0x28] sm:$0xff]  ;;  %v455_v9 = vld [vmem:[#allocation14 + $0x20] sm:$0xff]  ;;  %v554_v31 = vld [vmem:[#allocation15 + $0x50] sm:$0xff] }
  0x75   :  { %766 = vmatprep.subr.mxu0 %v1140_v0  ;;  %796 = vmatpush3.msra.mxu1 %v296_v41  ;;  %v557_v28 = vld [vmem:[#allocation15 + $0x68] sm:$0xff]  ;;  %v556_v29 = vld [vmem:[#allocation15 + $0x60] sm:$0xff]  ;;  %v550_v35 = vld [vmem:[#allocation15 + $0x30] sm:$0xff] }
  0x76   :  { %767 = vmatpush3.msra.mxu0 %v148_v11  ;;  %797 = vmatprep.subr.mxu1 %v1140_v0  ;;  %v552_v33 = vld [vmem:[#allocation15 + $0x40] sm:$0xff] }
  0x77   :  { %768 = vmatprep.subr.mxu0 %v1140_v0  ;;  %798 = vmatpush3.msra.mxu1 %v295_v43  ;;  %v548_v37 = vld [vmem:[#allocation15 + $0x20] sm:$0xff] }
  0x78   :  { %769 = vmatpush3.msra.mxu0 %v147_v12  ;;  %799 = vmatprep.subr.mxu1 %v1140_v0 }
  0x79   :  { %770 = vmatprep.subr.mxu0 %v1140_v0  ;;  %800 = vmatpush3.msra.mxu1 %v294_v45  ;;  %v546_v45 = vld [vmem:[#allocation15 + $0x10] sm:$0xff] }
  0x7a   :  { %771 = vmatpush3.msra.mxu0 %v146_v13  ;;  %801 = vmatprep.subr.mxu1 %v1140_v0 }
  0x7b   :  { %772 = vmatprep.subr.mxu0 %v1140_v0  ;;  %802 = vmatpush3.msra.mxu1 %v293_v47  ;;  %v544_v47 = vld [vmem:[#allocation15] sm:$0xff] }
  0x7c   :  { %773 = vmatpush3.msra.mxu0 %v145_v14  ;;  %803 = vmatprep.subr.mxu1 %v1140_v0  ;;  %v656_v14 = vld [vmem:[#allocation9 + $0x1] ss:$0 sm:$0xff] }
  0x7d   :  { %774 = vmatprep.subr.mxu0 %v1140_v0  ;;  %804 = vmatpush3.msra.mxu1 %v292_v49 }
  0x7e   :  { %775 = vmatpush3.msra.mxu0 %v144_v15  ;;  %805 = vmatprep.subr.mxu1 %v1140_v0 }
  0x7f   :  { %776 = vmatprep.subr.mxu0 %v1140_v0  ;;  %806 = vmatpush3.msra.mxu1 %v291_v51 }
  0x80   :  { %777 = vmatpush3.msra.mxu0 %v143_v16  ;;  %807 = vmatprep.subr.mxu1 %v1140_v0  ;;  %v657_v16 = vld [vmem:[#allocation9 + $0x2] ss:$0 sm:$0xff] }
  0x81   :  { %779 = vmatmul.mubr.f32.vlgmr.msra.gmra.mxu0 %v142_v17  ;;  %816 = vmatprep.subr.mxu0 %v1140_v0 }
  0x82   :  { %848 = vmatprep.mubr.msk.f32.mxu0 %vm1141_vm0, %v1140_v0  ;;  %817 = vmatpush3.msra.mxu0 %v286_v30  ;;  %v555_v30 = vld [vmem:[#allocation15 + $0x58] sm:$0xff] }
  0x83   :  { %818 = vmatprep.subr.mxu0 %v1140_v0  ;;  %808 = vmatpush3.msra.mxu1 %v290_v53  ;;  %v660_v53 = vld [vmem:[%s1345_s6 + $0x2] ss:$0 sm:$0xff] }
  0x84   :  { %819 = vmatpush3.msra.mxu0 %v285_v32  ;;  %809 = vmatprep.subr.mxu1 %v1140_v0  ;;  %v553_v32 = vld [vmem:[#allocation15 + $0x48] sm:$0xff] }
  0x85   :  { %820 = vmatprep.subr.mxu0 %v1140_v0  ;;  %810 = vmatpush3.msra.mxu1 %v289_v55 }
  0x86   :  { %821 = vmatpush3.msra.mxu0 %v284_v34  ;;  %811 = vmatprep.subr.mxu1 %v1140_v0  ;;  %v551_v34 = vld [vmem:[#allocation15 + $0x38] sm:$0xff] }
  0x87   :  { %822 = vmatprep.subr.mxu0 %v1140_v0  ;;  %812 = vmatpush3.msra.mxu1 %v288_v57 }
  0x88   :  { %823 = vmatpush3.msra.mxu0 %v283_v36  ;;  %814 = vmatmul.mubr.f32.vlgmr.msra.gmra.mxu1 %v287_v59  ;;  %v549_v36 = vld [vmem:[#allocation15 + $0x28] sm:$0xff] }
  0x89   :  { %824 = vmatprep.subr.mxu0 %v1140_v0  ;;  %851 = vmatprep.subr.mxu1 %v1140_v0 }
  0x8a   :  { %825 = vmatpush3.msra.mxu0 %v282_v38  ;;  %883 = vmatprep.mubr.msk.f32.mxu1 %vm1141_vm0, %v1140_v0  ;;  %v547_v38 = vld [vmem:[#allocation15 + $0x18] sm:$0xff] }
  0x8b   :  { %826 = vmatprep.subr.mxu0 %v1140_v0  ;;  %852 = vmatpush3.msra.mxu1 %v466_v61 }
  0x8c   :  { %827 = vmatpush3.msra.mxu0 %v281_v40  ;;  %853 = vmatprep.subr.mxu1 %v1140_v0  ;;  %v658_v40 = vld [vmem:[%s1345_s6] ss:$0 sm:$0xff] }
  0x8d   :  { %828 = vmatprep.subr.mxu0 %v1140_v0  ;;  %854 = vmatpush3.msra.mxu1 %v465_v62 }
  0x8e   :  { %829 = vmatpush3.msra.mxu0 %v280_v42  ;;  %855 = vmatprep.subr.mxu1 %v1140_v0 }
  0x8f   :  { %830 = vmatprep.subr.mxu0 %v1140_v0  ;;  %856 = vmatpush3.msra.mxu1 %v464_v63 }
  0x90   :  { %831 = vmatpush3.msra.mxu0 %v279_v44  ;;  %857 = vmatprep.subr.mxu1 %v1140_v0 }
  0x91   :  { %832 = vmatprep.subr.mxu0 %v1140_v0  ;;  %858 = vmatpush3.msra.mxu1 %v463_v1 }
  0x92   :  { %833 = vmatpush3.msra.mxu0 %v278_v46  ;;  %859 = vmatprep.subr.mxu1 %v1140_v0  ;;  %v545_v46 = vld [vmem:[#allocation15 + $0x8] sm:$0xff] }
  0x93   :  { %834 = vmatprep.subr.mxu0 %v1140_v0  ;;  %860 = vmatpush3.msra.mxu1 %v462_v2 }
  0x94   :  { %835 = vmatpush3.msra.mxu0 %v277_v48  ;;  %861 = vmatprep.subr.mxu1 %v1140_v0  ;;  %v659_v48 = vld [vmem:[%s1345_s6 + $0x1] ss:$0 sm:$0xff] }
  0x95   :  { %836 = vmatprep.subr.mxu0 %v1140_v0  ;;  %862 = vmatpush3.msra.mxu1 %v461_v3 }
  0x96   :  { %837 = vmatpush3.msra.mxu0 %v276_v50  ;;  %863 = vmatprep.subr.mxu1 %v1140_v0 }
  0x97   :  { %838 = vmatprep.subr.mxu0 %v1140_v0  ;;  %864 = vmatpush3.msra.mxu1 %v460_v4 }
  0x98   :  { %839 = vmatpush3.msra.mxu0 %v275_v52  ;;  %865 = vmatprep.subr.mxu1 %v1140_v0 }
  0x99   :  { %840 = vmatprep.subr.mxu0 %v1140_v0  ;;  %866 = vmatpush3.msra.mxu1 %v459_v5 }
  0x9a   :  { %841 = vmatpush3.msra.mxu0 %v274_v54  ;;  %867 = vmatprep.subr.mxu1 %v1140_v0 }
  0x9b   :  { %842 = vmatprep.subr.mxu0 %v1140_v0  ;;  %868 = vmatpush3.msra.mxu1 %v458_v6 }
  0x9c   :  { %843 = vmatpush3.msra.mxu0 %v273_v56  ;;  %869 = vmatprep.subr.mxu1 %v1140_v0 }
  0x9d   :  { %844 = vmatprep.subr.mxu0 %v1140_v0  ;;  %870 = vmatpush3.msra.mxu1 %v457_v7 }
  0x9e   :  { %845 = vmatpush3.msra.mxu0 %v272_v58  ;;  %871 = vmatprep.subr.mxu1 %v1140_v0 }
  0x9f   :  { %846 = vmatprep.subr.mxu0 %v1140_v0  ;;  %872 = vmatpush3.msra.mxu1 %v456_v8 }
  0xa0   :  { %847 = vmatpush3.msra.mxu0 %v271_v60  ;;  %873 = vmatprep.subr.mxu1 %v1140_v0 }
  0xa1   :  { %886 = vmatprep.subr.mxu0 %v1140_v0  ;;  %874 = vmatpush3.msra.mxu1 %v455_v9 }
  0xa2   :  { %875 = vmatprep.subr.mxu1 %v1140_v0 }
 0x141   :  { %v225_v19 = vpop.f32.mrf.mxu0 }
 0x142   :  { %v243_v20 = vadd.f32 %v654_v18, %v225_v19 }
 0x143   :  { %v780_v21 = vpop.f32.mrf.mxu0 }
 0x144   :  { %244 = vadd.xlane.f32.xlu0 %v243_v20  ;;  %v454_v21 = vld [vmem:[#allocation14 + $0x18] sm:$0xff] }
 0x145   :  { %876 = vmatpush3.msra.mxu1 %v454_v21 }
 0x146   :  { %877 = vmatprep.subr.mxu1 %v1140_v0 }
 0x1cd   :  { %v245_v22 = vpop.xlane.xlu0 %244 }
 0x1ce   :  { %v246_v23 = vmul.f32 0.0625, %v245_v22 }
 0x1d0   :  { %v247_v25 = vsub.f32 %v243_v20, %v246_v23  ;;  %v370_v20 = vpop.f32.mrf.mxu1  ;;  %v453_v23 = vld [vmem:[#allocation14 + $0x10] sm:$0xff] }
 0x1d1   :  { %878 = vmatpush3.msra.mxu1 %v453_v23 }
 0x1d2   :  { %v1256_v26 = vmul.f32 %v655_v24, %v247_v25  ;;  %v815_v22 = vpop.f32.mrf.mxu1  ;;  %879 = vmatprep.subr.mxu1 %v1140_v0  ;;  %v452_v24 = vld [vmem:[#allocation14 + $0x8] sm:$0xff]  ;;  %v451_v25 = vld [vmem:[#allocation14] sm:$0xff] }
 0x1d3   :  { %880 = vmatpush3.msra.mxu1 %v452_v24 }
 0x1d4   :  { %v253_v27 = vmul.f32 %v1256_v26, %v1256_v26  ;;  %881 = vmatprep.subr.mxu1 %v1140_v0 }
 0x1d5   :  { %882 = vmatpush3.msra.mxu1 %v451_v25 }
 0x1d6   :  { %254 = vadd.xlane.f32.xlu0 %v253_v27  ;;  %v558_v27 = vld [vmem:[#allocation15 + $0x70] sm:$0xff] }
 0x25f   :  { %v255_v10 = vpop.xlane.xlu0 %254 }
 0x260   :  { %v256_v11 = vmul.f32 0.0625, %v255_v10 }
 0x262   :  { %v257_v12 = vadd.f32 1e-05, %v256_v11 }
 0x264   :  { %934 = vrsqrt.f32 %v257_v12 }
 0x271   :  { %v935_v13 = vpop.eup %934 }
 0x272   :  { %v259_v15 = vmul.f32 %v935_v13, %v1256_v26  ;;  %v559_v26 = vld [vmem:[#allocation15 + $0x78] sm:$0xff] }
 0x274   :  { %v264_v17 = vmul.f32 %v656_v14, %v259_v15 }
 0x276   :  { %v269_v18 = vadd.f32 %v657_v16, %v264_v17 }
 0x278   :  { %936 = vtanh.f32 %v269_v18 }
 0x285   :  { %v937_v19 = vpop.eup %936 }
 0x286   :  { %849 = vmatmul.mubr.f32.vlgmr.msra.gmra.mxu0 %v937_v19 }
 0x287   :  { %918 = vmatprep.mubr.msk.f32.mxu0 %vm1141_vm0, %v1140_v0  ;;  %887 = vmatpush3.msra.mxu0 %v559_v26 }
 0x288   :  { %888 = vmatprep.subr.mxu0 %v1140_v0 }
 0x289   :  { %889 = vmatpush3.msra.mxu0 %v558_v27 }
 0x28a   :  { %890 = vmatprep.subr.mxu0 %v1140_v0 }
 0x28b   :  { %891 = vmatpush3.msra.mxu0 %v557_v28 }
 0x28c   :  { %892 = vmatprep.subr.mxu0 %v1140_v0 }
 0x28d   :  { %893 = vmatpush3.msra.mxu0 %v556_v29 }
 0x28e   :  { %894 = vmatprep.subr.mxu0 %v1140_v0 }
 0x28f   :  { %895 = vmatpush3.msra.mxu0 %v555_v30 }
 0x290   :  { %896 = vmatprep.subr.mxu0 %v1140_v0 }
 0x291   :  { %897 = vmatpush3.msra.mxu0 %v554_v31 }
 0x292   :  { %898 = vmatprep.subr.mxu0 %v1140_v0 }
 0x293   :  { %899 = vmatpush3.msra.mxu0 %v553_v32 }
 0x294   :  { %900 = vmatprep.subr.mxu0 %v1140_v0 }
 0x295   :  { %901 = vmatpush3.msra.mxu0 %v552_v33 }
 0x296   :  { %902 = vmatprep.subr.mxu0 %v1140_v0 }
 0x297   :  { %903 = vmatpush3.msra.mxu0 %v551_v34 }
 0x298   :  { %904 = vmatprep.subr.mxu0 %v1140_v0 }
 0x299   :  { %905 = vmatpush3.msra.mxu0 %v550_v35 }
 0x29a   :  { %906 = vmatprep.subr.mxu0 %v1140_v0 }
 0x29b   :  { %907 = vmatpush3.msra.mxu0 %v549_v36 }
 0x29c   :  { %908 = vmatprep.subr.mxu0 %v1140_v0 }
 0x29d   :  { %909 = vmatpush3.msra.mxu0 %v548_v37 }
 0x29e   :  { %910 = vmatprep.subr.mxu0 %v1140_v0 }
 0x29f   :  { %911 = vmatpush3.msra.mxu0 %v547_v38 }
 0x2a0   :  { %912 = vmatprep.subr.mxu0 %v1140_v0 }
 0x2a1   :  { %913 = vmatpush3.msra.mxu0 %v546_v45 }
 0x2a2   :  { %914 = vmatprep.subr.mxu0 %v1140_v0 }
 0x2a3   :  { %915 = vmatpush3.msra.mxu0 %v545_v46 }
 0x2a4   :  { %916 = vmatprep.subr.mxu0 %v1140_v0 }
 0x2a5   :  { %917 = vmatpush3.msra.mxu0 %v544_v47 }
 0x346   :  { %v440_v39 = vpop.f32.mrf.mxu0 }
 0x347   :  { %v441_v41 = vadd.f32 %v440_v39, %v370_v20 }
 0x348   :  { %v850_v42 = vpop.f32.mrf.mxu0 }
 0x349   :  { %v449_v43 = vadd.f32 %v658_v40, %v441_v41 }
 0x34b   :  { %v450_v44 = vmax.f32 %v449_v43, 0.0 }
 0x34d   :  { %884 = vmatmul.mubr.f32.vlgmr.msra.gmra.mxu1 %v450_v44 }
 0x40d   :  { %v538_v49 = vpop.f32.mrf.mxu1 }
 0x40e   :  { %v539_v50 = vadd.f32 %v659_v48, %v538_v49 }
 0x40f   :  { %v885_v51 = vpop.f32.mrf.mxu1 }
 0x410   :  { %v542_v52 = vmax.f32 %v539_v50, 0.0 }
 0x412   :  { %919 = vmatmul.mubr.f32.vlgmr.msra.gmra.mxu0 %v542_v52 }
 0x4d2   :  { %v630_v54 = vpop.f32.mrf.mxu0 }
 0x4d3   :  { %v631_v55 = vadd.f32 %v660_v53, %v630_v54 }
 0x4d4   :  { %v920_v0 = vpop.f32.mrf.mxu0 }
 0x4d5   :  { %634 = vst [vmem:[#allocation17] sm:$0xff] %v631_v55 }
 0x4d6   :  { %1109 = shalt.err (!%p1106_p2)
}
 0x4d7   :  { %644 = dma.vmem_to_hbm [thread:$0]  %s642_s27, 128, %s1348_s9, [#allocation5]  }
 0x4d8   :  { %1128 = dma.done.wait [#allocation5], 128  }
 0x4d9   :  { %1129 = vsyncadd [#allocation5], 4294967168 }
 0x4da   :  { %648 = vsyncpa [#allocation4], 1 }
 0x4db   :  { %649 = vsyncpa [#allocation7], 1 }
 0x4dc   :  { %650 = vsyncpa [#allocation10], 1 }
 0x4dd   :  { %651 = vsyncpa [#allocation13], 1 }
 0x4de   :  { %652 = vsyncpa [#allocation16], 1 }
 0x4df   :  { %653 = vsyncpa [#allocation5], 1 }

</bundles_post_ra>
